<compile_context>
chip_gen: v7x
topology: tpu7x:2x2x1
jax: 0.10.0
libtpu: 0.0.40
codegen_flags: <defaults>
</compile_context>

<pallas_src>
import functools
import math

import jax
import jax.numpy as jnp
from jax import lax
from jax.experimental import pallas as pl
from jax.experimental.pallas import tpu as pltpu


DEFAULT_TM = 512
DEFAULT_TN = 1024
DEFAULT_TK = 512
_VMEM_LIMIT_BYTES = 48 * 1024 * 1024


def _k_tile(K, tk):
    return K if K <= tk else tk


def prepare_feature_aligner_params(weight, bias, *, tk=DEFAULT_TK):
    """One-time parameter prep (keep OUT of the per-step hot path).

    weight: (N, K) PyTorch nn.Linear layout -> returns (K_pad, N), K-major.
    bias  : (N,)                            -> returns (1, N).
    K is zero-padded to a multiple of the K tile so the forward never pads.
    """
    N, K = weight.shape
    tk_ = _k_tile(K, tk)
    k_pad = pl.cdiv(K, tk_) * tk_
    w_kn = jnp.asarray(weight).T            # (K, N), canonical MXU RHS feed
    if k_pad != K:
        w_kn = jnp.pad(w_kn, ((0, k_pad - K), (0, 0)))
    return w_kn, jnp.asarray(bias).reshape(1, N)


def _linear_kernel_single(x_ref, w_ref, b_ref, o_ref):
    # Whole K in one tile: no accumulator scratch, write the output directly.
    o_ref[...] = (
        jnp.dot(x_ref[...], w_ref[...], preferred_element_type=jnp.float32)
        + b_ref[...]
    ).astype(o_ref.dtype)


def _linear_kernel_acc(x_ref, w_ref, b_ref, o_ref, acc_ref, *, k_rem):
    # x_ref : (tm, tk) tile of the flattened input
    # w_ref : (tk, tn) tile of the pre-transposed (K_pad, N) weight
    # b_ref : (1, tn)  bias tile
    # o_ref : (tm, tn) output tile (resident across the K grid axis)
    # acc_ref: (tm, tn) f32 accumulator scratch
    k = pl.program_id(2)
    nk = pl.num_programs(2)

    @pl.when(k == 0)
    def _():
        # Seed the accumulator with the bias: saves a zero-fill + a final add.
        acc_ref[...] = jnp.broadcast_to(
            b_ref[...].astype(jnp.float32), acc_ref.shape)

    x = x_ref[...]
    if k_rem:
        # The last K tile extends past the true K (weight rows there are
        # zero-padded); zero the matching x columns so out-of-bounds data
        # contributes exactly nothing.
        col = lax.broadcasted_iota(jnp.int32, x.shape, 1)
        x = jnp.where((k < nk - 1) | (col < k_rem), x, 0.0)

    acc_ref[...] += jnp.dot(x, w_ref[...], preferred_element_type=jnp.float32)

    @pl.when(k == nk - 1)
    def _():
        o_ref[...] = acc_ref[...].astype(o_ref.dtype)


@functools.partial(jax.jit, static_argnames=("tm", "tn", "tk"))
def feature_aligner_forward(image_features, w_kn, bias2d, *,
                            tm=DEFAULT_TM, tn=DEFAULT_TN, tk=DEFAULT_TK):
    """y = image_features @ W^T + b (same semantics as nn.Linear).

    image_features: (..., K) float32
    w_kn          : (K_pad, N) weight from prepare_feature_aligner_params
    bias2d        : (1, N)
    returns       : (..., N)
    """
    *lead, K = image_features.shape
    k_pad, N = w_kn.shape
    M = math.prod(lead) if lead else 1

    tk_ = _k_tile(K, tk)
    if k_pad != pl.cdiv(K, tk_) * tk_:
        raise ValueError(
            "weight was prepared with a different K tile; pass the same `tk` "
            "to prepare_feature_aligner_params and feature_aligner_forward.")

    x2d = image_features.reshape(M, K)

    # Tile selection: full dim when it fits in one block, else the default tile.
    tm_ = M if M <= tm else tm
    tn_ = N if N <= tn else tn

    grid_m = pl.cdiv(M, tm_)
    # Megacore (v7x): if the M axis collapses to one block, split N so at
    # least one "parallel" axis has >= 2 blocks and both TensorCores get work.
    if grid_m == 1 and tn_ == N and N >= 256:
        half = pl.cdiv(pl.cdiv(N, 2), 128) * 128
        if half < N:
            tn_ = half
    grid_n = pl.cdiv(N, tn_)

    nk = k_pad // tk_
    k_rem = K % tk_

    out_shape = jax.ShapeDtypeStruct((M, N), image_features.dtype)
    cost = pl.CostEstimate(
        flops=2 * M * K * N,
        transcendentals=0,
        # account for the (grid_n)x activation and (grid_m)x weight re-reads
        bytes_accessed=4 * (M * K * grid_n + k_pad * N * grid_m + M * N + N),
    )

    if nk == 1:
        # K fits one tile: scratch-free kernel, 2-D grid, direct output write.
        out2d = pl.pallas_call(
            _linear_kernel_single,
            out_shape=out_shape,
            grid_spec=pltpu.PrefetchScalarGridSpec(
                num_scalar_prefetch=0,
                grid=(grid_m, grid_n),
                in_specs=[
                    pl.BlockSpec((tm_, tk_), lambda i, j: (i, 0)),   # x
                    pl.BlockSpec((tk_, tn_), lambda i, j: (0, j)),   # W (K,N)
                    pl.BlockSpec((1, tn_), lambda i, j: (0, j)),     # bias
                ],
                out_specs=pl.BlockSpec((tm_, tn_), lambda i, j: (i, j)),
            ),
            compiler_params=pltpu.CompilerParams(
                dimension_semantics=("parallel", "parallel"),
                vmem_limit_bytes=_VMEM_LIMIT_BYTES,
            ),
            cost_estimate=cost,
        )(x2d, w_kn, bias2d)
    else:
        out2d = pl.pallas_call(
            functools.partial(_linear_kernel_acc, k_rem=k_rem),
            out_shape=out_shape,
            grid_spec=pltpu.PrefetchScalarGridSpec(
                num_scalar_prefetch=0,
                grid=(grid_m, grid_n, nk),
                in_specs=[
                    pl.BlockSpec((tm_, tk_), lambda i, j, k: (i, k)),  # x
                    pl.BlockSpec((tk_, tn_), lambda i, j, k: (k, j)),  # W (K,N)
                    pl.BlockSpec((1, tn_), lambda i, j, k: (0, j)),    # bias
                ],
                out_specs=pl.BlockSpec((tm_, tn_), lambda i, j, k: (i, j)),
                scratch_shapes=[pltpu.VMEM((tm_, tn_), jnp.float32)],
            ),
            compiler_params=pltpu.CompilerParams(
                dimension_semantics=("parallel", "parallel", "arbitrary"),
                vmem_limit_bytes=_VMEM_LIMIT_BYTES,
            ),
            cost_estimate=cost,
        )(x2d, w_kn, bias2d)

    return out2d.reshape(*lead, N)


def init_feature_aligner_params(key, image_feature_dim, token_dim):
    """Deterministic synthetic init matching nn.Linear parameter shapes."""
    k_w, k_b = jax.random.split(key)
    bound = 1.0 / (image_feature_dim ** 0.5)
    weight = jax.random.uniform(
        k_w, (token_dim, image_feature_dim), jnp.float32, -bound, bound)
    bias = jax.random.uniform(
        k_b, (token_dim,), jnp.float32, -bound, bound)
    return weight, bias


if __name__ == "__main__":
    key = jax.random.PRNGKey(0)
    k_x, k_p, k_x2, k_p2, k_x3, k_p3 = jax.random.split(key, 6)

    # --- Main demo: (batch, seq, image_feature_dim) -> (batch, seq, token_dim)
    batch, seq = 2, 8
    image_feature_dim, token_dim = 32, 64
    image_features = jax.random.normal(
        k_x, (batch, seq, image_feature_dim), jnp.float32)
    weight, bias = init_feature_aligner_params(
        k_p, image_feature_dim, token_dim)
    w_kn, b2d = prepare_feature_aligner_params(weight, bias)

    out = feature_aligner_forward(image_features, w_kn, b2d)
    out = jax.block_until_ready(out)
    ref = image_features @ weight.T + bias
    assert out.shape == (batch, seq, token_dim)
    assert jnp.allclose(out, ref, atol=1e-5, rtol=1e-5)

    # --- Multi-block M/N/K path: K split + in-kernel remainder masking ------
    M2, K2, N2 = 48, 320, 192
    x2 = jax.random.normal(k_x2, (M2, K2), jnp.float32)
    w2, bias2 = init_feature_aligner_params(k_p2, K2, N2)
    w2_kn, b2_2d = prepare_feature_aligner_params(w2, bias2, tk=128)
    out2 = jax.block_until_ready(
        feature_aligner_forward(x2, w2_kn, b2_2d, tm=16, tn=128, tk=128))
    ref2 = x2 @ w2.T + bias2
    assert out2.shape == (M2, N2)
    assert jnp.allclose(out2, ref2, atol=1e-4, rtol=1e-4)

    # --- Megacore-split path: single M block, N split across >= 2 blocks ----
    M3, K3, N3 = 8, 32, 256
    x3 = jax.random.normal(k_x3, (M3, K3), jnp.float32)
    w3, bias3 = init_feature_aligner_params(k_p3, K3, N3)
    w3_kn, b3_2d = prepare_feature_aligner_params(w3, bias3)
    out3 = jax.block_until_ready(feature_aligner_forward(x3, w3_kn, b3_2d))
    ref3 = x3 @ w3.T + bias3
    assert out3.shape == (M3, N3)
    assert jnp.allclose(out3, ref3, atol=1e-5, rtol=1e-5)

    print("KERNEL_OK")
</pallas_src>

<mosaic_0001>
module attributes {stable_mosaic.version = 11 : i64} {
  func.func @_linear_kernel_single(%arg0: i32, %arg1: i32, %arg2: memref<16x32xf32, #tpu.memory_space<vmem>>, %arg3: memref<32x64xf32, #tpu.memory_space<vmem>>, %arg4: memref<1x64xf32, #tpu.memory_space<vmem>>, %arg5: memref<16x64xf32, #tpu.memory_space<vmem>>) attributes {dimension_semantics = [#tpu.dimension_semantics<parallel>, #tpu.dimension_semantics<parallel>], iteration_bounds = array<i64: 1, 1>, scalar_prefetch = 0 : i64, scratch_operands = 0 : i64, tpu.core_type = #tpu.core_type<tc>, window_params = [{transform_indices = @transform_0, window_bounds = array<i64: 16, 32>}, {transform_indices = @transform_1, window_bounds = array<i64: 32, 64>}, {transform_indices = @transform_2, window_bounds = array<i64: 1, 64>}, {transform_indices = @transform_3, window_bounds = array<i64: 16, 64>}]} {
    %c0 = arith.constant 0 : index
    %c0_0 = arith.constant 0 : index
    %0 = vector.load %arg2[%c0, %c0_0] : memref<16x32xf32, #tpu.memory_space<vmem>>, vector<16x32xf32>
    %c0_1 = arith.constant 0 : index
    %c0_2 = arith.constant 0 : index
    %1 = vector.load %arg3[%c0_1, %c0_2] : memref<32x64xf32, #tpu.memory_space<vmem>>, vector<32x64xf32>
    %cst = arith.constant dense<0.000000e+00> : vector<16x64xf32>
    %2 = tpu.matmul %0, %1, %cst {dimension_numbers = #tpu.dot_dimension_numbers<[1], [0], [0], [1], [0, 0, 1, 1], [], []>} : vector<16x32xf32>, vector<32x64xf32>, vector<16x64xf32> -> vector<16x64xf32>
    %c0_3 = arith.constant 0 : index
    %c0_4 = arith.constant 0 : index
    %3 = vector.load %arg4[%c0_3, %c0_4] : memref<1x64xf32, #tpu.memory_space<vmem>>, vector<1x64xf32>
    %4 = vector.broadcast %3 : vector<1x64xf32> to vector<16x64xf32>
    %5 = arith.addf %2, %4 : vector<16x64xf32>
    %c0_5 = arith.constant 0 : index
    %c0_6 = arith.constant 0 : index
    %6 = vector.load %arg5[%c0_5, %c0_6] : memref<16x64xf32, #tpu.memory_space<vmem>>, vector<16x64xf32>
    tpu.vector_store %arg5[%c0_5, %c0_6], %5 {strides = array<i32>} : memref<16x64xf32, #tpu.memory_space<vmem>>, vector<16x64xf32>,
    return
  }
  func.func @transform_0(%arg0: i32, %arg1: i32) -> (i32, i32) {
    %c0_i32 = arith.constant 0 : i32
    %c0_i32_0 = arith.constant 0 : i32
    return %arg0, %c0_i32 : i32, i32
  }
  func.func @transform_1(%arg0: i32, %arg1: i32) -> (i32, i32) {
    %c0_i32 = arith.constant 0 : i32
    %c0_i32_0 = arith.constant 0 : i32
    return %c0_i32, %arg1 : i32, i32
  }
  func.func @transform_2(%arg0: i32, %arg1: i32) -> (i32, i32) {
    %c0_i32 = arith.constant 0 : i32
    %c0_i32_0 = arith.constant 0 : i32
    return %c0_i32, %arg1 : i32, i32
  }
  func.func @transform_3(%arg0: i32, %arg1: i32) -> (i32, i32) {
    %c0_i32 = arith.constant 0 : i32
    return %arg0, %arg1 : i32, i32
  }
}

</mosaic_0001>

<bundles_post_ra>
// kernel: feature_aligner_forward.1
= control target key start
LH: loop header
LB: loop body
LE: loop exit
PB: predicated region body
PF: predicated region fallthrough
CT: control target
= control target key end

     0   :  { %8 = vsyncpa [#allocation3], 0  ;;  %s337_s0 = inlined_call_operand.hbm [shape: f32[16,32], index: 0, kind: input, shape index: {}]   ;;  %s338_s1 = inlined_call_operand.hbm [shape: f32[32,64], index: 1, kind: input, shape index: {}]   ;;  %s339_s2 = inlined_call_operand.vmem [shape: f32[1,64], index: 2, kind: input, shape index: {}]   ;;  %s340_s3 = inlined_call_operand.hbm [shape: f32[16,64], index: 3, kind: output, shape index: {}]  }
   0x1   :  { %9 = vsyncpa [#allocation6], 0 }
   0x2   :  { %10 = vsyncpa [#allocation4], 0  ;;  %s264_s12 = smov [#allocation2]   ;;  %s192_s16 = scalar_lea.hbm %s337_s0, 256 }
   0x3   :  { %s16_s13 = sshll.u32 %s264_s12, 4  ;;  %p193_p0 = scmp.ne.s32.totalorder %s337_s0, %s192_s16  ;;  %s17_s13 = int_to_ptr.vmem [resolvable:$true] %s16_s13 }
   0x4   :  { %p196_p1 = scmp.lt.u32.totalorder %s192_s16, %s337_s0 }
   0x6   :  { %p198_p2 = pnand %p196_p1, %p193_p0 }
   0x8   :  { %201 = shalt.err (!%p198_p2)
}
   0x9   :  { %s202_s21 = scalar_lea.vmem %s17_s13, 256  ;;  %p207_p4 = scmp.lt.s32.totalorder %s17_s13, %s17_s13 }
   0xa   :  { %p203_p3 = scmp.ne.s32.totalorder %s17_s13, %s202_s21  ;;  %p208_p5 = scmp.lt.s32.totalorder %s202_s21, %s202_s21 }
   0xc   :  { %p209_p6 = por %p208_p5, %p207_p4 }
   0xe   :  { %p210_p7 = pnand %p209_p6, %p203_p3 }
  0x10   :  { %213 = shalt.err (!%p210_p7)
}
  0x11   :  { %s265_s22 = smov 128   ;;  %s266_s23 = smov 8  }
  0x12   :  { %22 = dma.hbm_to_vmem [thread:$0]  %s337_s0, 256, %s17_s13, [#allocation3], %s265_s22, %s265_s22, %s266_s23  }
  0x13   :  { %s267_s26 = smov [#allocation5]   ;;  %s214_s30 = scalar_lea.hbm %s338_s1, 512 }
  0x14   :  { %s28_s27 = sshll.u32 %s267_s26, 4  ;;  %p215_p8 = scmp.ne.s32.totalorder %s338_s1, %s214_s30  ;;  %s29_s27 = int_to_ptr.vmem [resolvable:$true] %s28_s27 }
  0x15   :  { %p218_p9 = scmp.lt.u32.totalorder %s214_s30, %s338_s1 }
  0x17   :  { %p220_p10 = pnand %p218_p9, %p215_p8 }
  0x19   :  { %223 = shalt.err (!%p220_p10)
}
  0x1a   :  { %s224_s8 = scalar_lea.vmem %s29_s27, 512  ;;  %p229_p12 = scmp.lt.s32.totalorder %s29_s27, %s29_s27 }
  0x1b   :  { %p225_p11 = scmp.ne.s32.totalorder %s29_s27, %s224_s8  ;;  %p230_p13 = scmp.lt.s32.totalorder %s224_s8, %s224_s8 }
  0x1d   :  { %p231_p0 = por %p230_p13, %p229_p12 }
  0x1f   :  { %p232_p1 = pnand %p231_p0, %p225_p11 }
  0x21   :  { %235 = shalt.err (!%p232_p1)
}
  0x22   :  { %34 = dma.hbm_to_vmem [thread:$0]  %s338_s1, 512, %s29_s27, [#allocation6], %s265_s22, %s265_s22, %s266_s23  }
  0x23   :  { %258 = dma.done.wait [#allocation3], 256  }
  0x24   :  { %259 = vsyncadd [#allocation3], 4294967040 }
  0x25   :  { %260 = dma.done.wait [#allocation6], 512  }
  0x26   :  { %261 = vsyncadd [#allocation6], 4294966784  ;;  %vm56_vm0 = vcmask 261120   ;;  %v45_v0 = vld [vmem:[#allocation5] sm:$0xff]  ;;  %v46_v1 = vld [vmem:[#allocation5 + $0x8] sm:$0xff]  ;;  %s268_s11 = smov [#allocation7]  }
  0x27   :  { %v47_v2 = vld [vmem:[#allocation5 + $0x10] sm:$0xff]  ;;  %v179_v3 = vpack.c.bf16 %v46_v1, %v45_v0  ;;  %v48_v4 = vld [vmem:[#allocation5 + $0x18] sm:$0xff]  ;;  %s146_s12 = sshll.u32 %s268_s11, 4  ;;  %vm138_vm1 = vcmask 523264   ;;  %s147_s12 = int_to_ptr.vmem [resolvable:$true] %s146_s12 }
  0x28   :  { %v43_v5 = vld [vmem:[#allocation2] sm:$0xff]  ;;  %v183_v6 = vpack.c.bf16 %v48_v4, %v47_v2  ;;  %v44_v7 = vld [vmem:[#allocation2 + $0x8] sm:$0xff]  ;;  %s236_s13 = scalar_lea.vmem %s147_s12, 256  ;;  %p241_p3 = scmp.lt.s32.totalorder %s147_s12, %s147_s12 }
  0x29   :  { %176 = vmatprep.mubr.msk.f32.mxu0 %vm56_vm0, %v43_v5  ;;  %180 = vmatprep.subr.bf16.mxu0 %v179_v3  ;;  %v159_v8 = vld [vmem:[%s339_s2] ss:$0 sm:$0xff]  ;;  %p237_p2 = scmp.ne.s32.totalorder %s147_s12, %s236_s13  ;;  %p242_p4 = scmp.lt.s32.totalorder %s236_s13, %s236_s13 }
  0x2a   :  { %182 = vmatpush3.bf16.msra.mxu0 %v179_v3 }
  0x2b   :  { %184 = vmatprep.subr.bf16.mxu0 %v183_v6  ;;  %p243_p5 = por %p242_p4, %p241_p3 }
  0x2d   :  { %p244_p6 = pnand %p243_p5, %p237_p2 }
  0x2e   :  { %186 = vmatpush3.bf16.msra.mxu0 %v183_v6 }
  0x31   :  { %177 = vmatmul.mubr.msk.f32.vlgmr.msra.gmra.mrb[0].mxu0 %vm56_vm0, %v44_v7 }
 0x104   :  { %v178_v9 = vpop.f32.mrb[0].mxu0 }
 0x105   :  { %v135_v10 = vadd.f32 %v178_v9, %v159_v8  ;;  %v129_v11 = vpop.f32.mrb[1].mxu0 }
 0x106   :  { %v130_v12 = vadd.f32 %v159_v8, %v129_v11 }
 0x107   :  { %140 = vst.msk [vmem:[#allocation7 + $0x8] sm:$0xff] %vm138_vm1, %v135_v10 }
 0x108   :  { %139 = vst.msk [vmem:[#allocation7] sm:$0xff] %vm138_vm1, %v130_v12 }
 0x109   :  { %247 = shalt.err (!%p244_p6)
}
 0x10a   :  { %s248_s2 = scalar_lea.hbm %s340_s3, 256 }
 0x10b   :  { %p249_p7 = scmp.ne.s32.totalorder %s340_s3, %s248_s2  ;;  %p252_p8 = scmp.lt.u32.totalorder %s248_s2, %s340_s3 }
 0x10d   :  { %p254_p9 = pnand %p252_p8, %p249_p7 }
 0x10f   :  { %257 = shalt.err (!%p254_p9)
}
 0x110   :  { %152 = dma.vmem_to_hbm [thread:$0]  %s147_s12, 256, %s340_s3, [#allocation4], %s265_s22, %s265_s22, %s266_s23  }
 0x111   :  { %262 = dma.done.wait [#allocation4], 256  }
 0x112   :  { %263 = vsyncadd [#allocation4], 4294967040 }
 0x113   :  { %156 = vsyncpa [#allocation3], 1 }
 0x114   :  { %157 = vsyncpa [#allocation6], 1 }
 0x115   :  { %158 = vsyncpa [#allocation4], 1 }

</bundles_post_ra>
